<compile_context>
chip_gen: v6e
topology: v6e:2x2x1
jax: 0.10.0
libtpu: 0.0.40
codegen_flags: <defaults>
</compile_context>

<pallas_src>
import functools

import jax
import jax.numpy as jnp
from jax.experimental import pallas as pl
from jax.experimental.pallas import tpu as pltpu


def _round_up(x, m):
    return (x + m - 1) // m * m


def _vmem_budget_bytes():
    """(working-set budget, vmem_limit_bytes) tuned per TPU generation."""
    try:
        kind = jax.devices()[0].device_kind.lower()
    except Exception:  # no device info (e.g. interpret/CPU) -> conservative
        kind = ""
    if ("v5" in kind) or ("v6" in kind):
        # 128 MiB VMEM parts: use most of it (bigger tiles on a mem-bound kernel).
        return 48 * 1024 * 1024, 96 * 1024 * 1024
    # v7x (64 MiB / TensorCore, both TCs active under "parallel") or unknown.
    return 16 * 1024 * 1024, 32 * 1024 * 1024


def _pick_tb_rows(budget_bytes, s_chunk, s_out, e2p, dp, w_isz):
    """Max batch-tile rows whose per-grid-step working set fits the budget."""
    fixed = 2 * (dp * dp + e2p * dp) * w_isz + 8 * dp * 4      # weights (dbuf) + bias/v
    per_row = (s_chunk * e2p * (2 * 4 + w_isz)   # enc chunk dbuf (f32) + MXU-dtype copy
               + 2 * s_chunk * dp * 4            # e_proj / energy f32 intermediates
               + 3 * s_out * 4                   # resident score block + softmax temps
               + 2 * s_chunk * 4                 # mask block, double buffered
               + 2 * dp * 4)                     # hidden block
    return int(max((budget_bytes - fixed) // per_row, 1))


def _choose_tb(batch, sub, target):
    """Pick (TB, padded_B).  Prefers TB that divides B (no batch padding of enc)."""
    target = min(max(sub, (target // sub) * sub), 256)
    if batch <= sub:
        return batch, batch                       # full-dim batch block, no padding
    if batch % sub == 0:
        t = (min(target, batch) // sub) * sub
        for cand in range(t, sub - 1, -sub):
            if batch % cand == 0:
                return cand, batch                # divides B exactly: zero batch pad
    # Fall back: minimal batch padding to a multiple of the sublane tile.
    bp = _round_up(batch, sub)
    t = min(target, bp)
    tb = sub
    for cand in range(t, sub - 1, -sub):
        if bp % cand == 0:
            tb = cand
            break
    return tb, bp


def _choose_s_chunk(s, cap):
    """S chunk (multiple of 128 when chunking; prefers exact division of S)."""
    if s <= cap:
        return s, 1
    for cand in range(cap, 127, -128):
        if s % cand == 0:
            return cand, s // cand
    return cap, -(-s // cap)                      # ragged tail, masked in-kernel


def _attention_kernel(hidden_ref, enc_ref, mask_ref, wh_ref, we_ref, bias_ref, v_ref,
                      out_ref, *, s_chunk, n_chunks, src_len, compute_dtype):
    """One (batch tile, src-len chunk) grid step.

    hidden [TB, Dp] ct, enc [Sc, TB, E2p] (f32 or ct, seq-major), mask [TB, Sc] i32,
    wh [Dp, Dp] ct, we [E2p, Dp] ct, bias/v [1, Dp] f32, out [TB, S_out] f32.
    """
    s = pl.program_id(1)

    # hidden @ Wh + bias (tiny vs. the enc matmul; simply recomputed per chunk).
    hb = jnp.dot(hidden_ref[...], wh_ref[...],
                 preferred_element_type=jnp.float32) + bias_ref[...]       # [TB, Dp]

    enc = enc_ref[...]                                                     # [Sc, TB, E2p]
    sc_len, tb, e2p = enc.shape
    dp = wh_ref.shape[1]

    # (Sc, TB, E2p) -> (Sc*TB, E2p) is a zero-cost view (TB is sublane-aligned);
    # per-tile cast feeds the MXU while HBM traffic stays in the original dtype.
    enc2d = enc.reshape(sc_len * tb, e2p).astype(compute_dtype)
    e_proj = jnp.dot(enc2d, we_ref[...],
                     preferred_element_type=jnp.float32).reshape(sc_len, tb, dp)

    # energy = tanh(attn(cat(hidden, enc))); elementwise math kept in f32.
    energy = jnp.tanh(e_proj + hb[None, :, :])                             # [Sc, TB, Dp]

    # v-projection (output width 1): VPU multiply + XLU cross-lane reduce.
    score = jnp.sum(energy * v_ref[...][None, :, :], axis=-1)              # [Sc, TB]
    score = score.T                                                        # [TB, Sc]

    # masked_fill(mask == 0, -1e10) for real positions; -inf for columns beyond
    # src_len (mask padding / ragged chunk tail), so degenerate all-masked rows
    # still normalize over the real src positions only (matches PyTorch).
    col = jax.lax.broadcasted_iota(jnp.int32, (tb, sc_len), 1) + s * s_chunk
    score = jnp.where(mask_ref[...] != 0, score, jnp.float32(-1e10))
    score = jnp.where(col < src_len, score, jnp.float32(-jnp.inf))

    if n_chunks == 1:
        # Single chunk: softmax directly, one store.
        m = jnp.max(score, axis=-1, keepdims=True)
        e = jnp.exp(score - m)
        denom = jnp.sum(e, axis=-1, keepdims=True)
        out_ref[...] = e * (1.0 / denom)                  # exact normalization
    else:
        # Stash raw masked scores into the resident [TB, S_out] output block.
        out_ref[:, pl.ds(s * s_chunk, s_chunk)] = score

        @pl.when(s == n_chunks - 1)
        def _finalize():
            sc_all = out_ref[...]                                          # [TB, S_out]
            m = jnp.max(sc_all, axis=-1, keepdims=True)
            e = jnp.exp(sc_all - m)
            denom = jnp.sum(e, axis=-1, keepdims=True)
            out_ref[...] = e * (1.0 / denom)              # exact normalization


def attention_forward(hidden, encoder_outputs, mask,
                      attn_weight, attn_bias, v_weight,
                      *, compute_dtype=jnp.bfloat16, block_b=None, s_chunk_cap=512):
    """
    hidden:          [B, dec_hid]
    encoder_outputs: [S, B, 2*enc_hid]  (PyTorch seq-major; consumed as-is)
    mask:            [B, S]  (0 = masked)
    attn_weight:     [dec_hid, 2*enc_hid + dec_hid]   (nn.Linear weight)
    attn_bias:       [dec_hid]
    v_weight:        [1, dec_hid]
    returns:         [B, S] float32 softmax attention weights
    """
    B, D = hidden.shape
    S, Be, E2 = encoder_outputs.shape
    assert Be == B, (Be, B)

    Dp = _round_up(D, 128)
    E2p = _round_up(E2, 128)

    # S is never padded on the dominant [S, B, E2] tensor; it is only chunked.
    s_chunk, n_chunks = _choose_s_chunk(S, s_chunk_cap)
    S_out = n_chunks * s_chunk

    budget, vmem_limit = _vmem_budget_bytes()
    w_isz = jnp.dtype(compute_dtype).itemsize
    sub = 16 if w_isz < 4 else 8                  # sublane tile of the compute dtype
    target = _pick_tb_rows(budget, s_chunk, S_out, E2p, Dp, w_isz)
    if block_b is not None:
        target = block_b
    TB, Bp = _choose_tb(B, sub, target)

    # --- weights: split the concatenated Linear, pad, cast (tiny tensors) ---
    wt = attn_weight.T                                                  # [D + E2, D]
    wh = jnp.pad(wt[:D, :], ((0, Dp - D), (0, Dp - D))).astype(compute_dtype)
    we = jnp.pad(wt[D:, :], ((0, E2p - E2), (0, Dp - D))).astype(compute_dtype)
    bias = jnp.pad(attn_bias.reshape(1, D), ((0, 0), (0, Dp - D))).astype(jnp.float32)
    v = jnp.pad(v_weight.reshape(1, D), ((0, 0), (0, Dp - D))).astype(jnp.float32)

    hidden_p = jnp.pad(hidden, ((0, Bp - B), (0, Dp - D))).astype(compute_dtype)
    mask_p = jnp.pad(mask.astype(jnp.int32), ((0, Bp - B), (0, S_out - S)))

    # --- encoder_outputs: avoid extra HBM passes over the dominant tensor ---
    if E2 == E2p and Bp == B:
        enc_p = encoder_outputs                   # consumed as-is (no pad/cast pass)
    else:
        # One fused pad(+cast) pass; the S axis stays unpadded.
        enc_p = jnp.pad(encoder_outputs, ((0, 0), (0, Bp - B), (0, E2p - E2)))
        enc_p = enc_p.astype(compute_dtype)

    kernel = functools.partial(
        _attention_kernel, s_chunk=s_chunk, n_chunks=n_chunks,
        src_len=S, compute_dtype=compute_dtype)

    # NOTE: weight specs are constant across the grid; their double-buffer cost
    # is only ~2*(Dp+E2p)*Dp elements, so pl.Buffered(1) is deliberately skipped.
    out = pl.pallas_call(
        kernel,
        out_shape=jax.ShapeDtypeStruct((Bp, S_out), jnp.float32),
        grid=(Bp // TB, n_chunks),
        in_specs=[
            pl.BlockSpec((TB, Dp), lambda b, s: (b, 0)),                 # hidden
            pl.BlockSpec((s_chunk, TB, E2p), lambda b, s: (s, b, 0)),    # enc (seq-major)
            pl.BlockSpec((TB, s_chunk), lambda b, s: (b, s)),            # mask
            pl.BlockSpec((Dp, Dp), lambda b, s: (0, 0)),                 # wh
            pl.BlockSpec((E2p, Dp), lambda b, s: (0, 0)),                # we
            pl.BlockSpec((1, Dp), lambda b, s: (0, 0)),                  # bias
            pl.BlockSpec((1, Dp), lambda b, s: (0, 0)),                  # v
        ],
        out_specs=pl.BlockSpec((TB, S_out), lambda b, s: (b, 0)),        # resident over s
        compiler_params=pltpu.CompilerParams(
            dimension_semantics=("parallel", "arbitrary"),
            vmem_limit_bytes=vmem_limit,
        ),
    )(hidden_p, enc_p, mask_p, wh, we, bias, v)

    return out[:B, :S]


def attention_reference(hidden, encoder_outputs, mask, attn_weight, attn_bias, v_weight):
    S = encoder_outputs.shape[0]
    h_rep = jnp.repeat(hidden[:, None, :], S, axis=1)                  # [B, S, D]
    enc = jnp.transpose(encoder_outputs, (1, 0, 2))                    # [B, S, E2]
    cat = jnp.concatenate([h_rep, enc], axis=2)
    energy = jnp.tanh(cat @ attn_weight.T + attn_bias)
    attn = (energy @ v_weight.T)[..., 0]
    attn = jnp.where(mask == 0, -1e10, attn)
    return jax.nn.softmax(attn, axis=1)


if __name__ == "__main__":
    def check(name, out, ref, atol, rtol):
        assert out.shape == ref.shape, (name, out.shape, ref.shape)
        assert jnp.allclose(out, ref, atol=atol, rtol=rtol), (name, out, ref)
        assert jnp.allclose(jnp.sum(out, axis=1), 1.0, atol=2e-3), (
            name, jnp.sum(out, axis=1))

    # ---- test 1: module-sized shapes: batch=2, src_len=8, enc_hid=16, dec_hid=32 ----
    B, S, ENC_HID, DEC_HID = 2, 8, 16, 32
    E2 = 2 * ENC_HID
    k1, k2, k3, k4, k5 = jax.random.split(jax.random.PRNGKey(0), 5)
    hidden = jax.random.normal(k1, (B, DEC_HID), dtype=jnp.float32)
    encoder_outputs = jax.random.normal(k2, (S, B, E2), dtype=jnp.float32)
    mask = jnp.ones((B, S), dtype=jnp.int32).at[1, -2:].set(0)
    attn_w = 0.1 * jax.random.normal(k3, (DEC_HID, E2 + DEC_HID), dtype=jnp.float32)
    attn_b = 0.1 * jax.random.normal(k4, (DEC_HID,), dtype=jnp.float32)
    v_w = 0.1 * jax.random.normal(k5, (1, DEC_HID), dtype=jnp.float32)

    ref1 = attention_reference(hidden, encoder_outputs, mask, attn_w, attn_b, v_w)

    out1_f32 = jax.block_until_ready(
        attention_forward(hidden, encoder_outputs, mask, attn_w, attn_b, v_w,
                          compute_dtype=jnp.float32))
    check("t1_f32", out1_f32, ref1, atol=1e-3, rtol=1e-3)

    out1_bf16 = jax.block_until_ready(
        attention_forward(hidden, encoder_outputs, mask, attn_w, attn_b, v_w))
    check("t1_bf16", out1_bf16, ref1, atol=2e-2, rtol=2e-2)

    # ---- test 2: multi-block batch grid (3 blocks of 8), ragged src_len=40 ----
    B2, S2, ENC2, DEC2 = 24, 40, 24, 48
    E22 = 2 * ENC2
    kk = jax.random.split(jax.random.PRNGKey(1), 6)
    hidden2 = jax.random.normal(kk[0], (B2, DEC2), dtype=jnp.float32)
    enc2 = jax.random.normal(kk[1], (S2, B2, E22), dtype=jnp.float32)
    mask2 = (jax.random.uniform(kk[2], (B2, S2)) > 0.25).astype(jnp.int32)
    mask2 = mask2.at[:, 0].set(1)
    attn_w2 = 0.1 * jax.random.normal(kk[3], (DEC2, E22 + DEC2), dtype=jnp.float32)
    attn_b2 = 0.1 * jax.random.normal(kk[4], (DEC2,), dtype=jnp.float32)
    v_w2 = 0.1 * jax.random.normal(kk[5], (1, DEC2), dtype=jnp.float32)

    ref2 = attention_reference(hidden2, enc2, mask2, attn_w2, attn_b2, v_w2)
    out2 = jax.block_until_ready(
        attention_forward(hidden2, enc2, mask2, attn_w2, attn_b2, v_w2,
                          compute_dtype=jnp.float32, block_b=8))
    check("t2_f32", out2, ref2, atol=1e-3, rtol=1e-3)

    # ---- test 3: long source exercising the S-chunked grid (2 chunks of 512);
    #      E2 % 128 == 0 and TB | B, so enc is consumed with zero wrapper passes ----
    B3, S3, ENC3, DEC3 = 16, 1024, 64, 64
    E23 = 2 * ENC3
    kj = jax.random.split(jax.random.PRNGKey(2), 6)
    hidden3 = jax.random.normal(kj[0], (B3, DEC3), dtype=jnp.float32)
    enc3 = jax.random.normal(kj[1], (S3, B3, E23), dtype=jnp.float32)
    mask3 = (jax.random.uniform(kj[2], (B3, S3)) > 0.3).astype(jnp.int32)
    mask3 = mask3.at[:, 0].set(1)
    attn_w3 = 0.1 * jax.random.normal(kj[3], (DEC3, E23 + DEC3), dtype=jnp.float32)
    attn_b3 = 0.1 * jax.random.normal(kj[4], (DEC3,), dtype=jnp.float32)
    v_w3 = 0.1 * jax.random.normal(kj[5], (1, DEC3), dtype=jnp.float32)

    ref3 = attention_reference(hidden3, enc3, mask3, attn_w3, attn_b3, v_w3)
    out3 = jax.block_until_ready(
        attention_forward(hidden3, enc3, mask3, attn_w3, attn_b3, v_w3,
                          compute_dtype=jnp.float32))
    check("t3_f32_chunked", out3, ref3, atol=1e-3, rtol=1e-3)

    print("KERNEL_OK")
</pallas_src>

<mosaic_0001>
module attributes {stable_mosaic.version = 11 : i64} {
  func.func @_attention_kernel(%arg0: i32, %arg1: i32, %arg2: memref<2x128xf32, #tpu.memory_space<vmem>>, %arg3: memref<8x2x128xf32, #tpu.memory_space<vmem>>, %arg4: memref<2x8xi32, #tpu.memory_space<vmem>>, %arg5: memref<128x128xf32, #tpu.memory_space<vmem>>, %arg6: memref<128x128xf32, #tpu.memory_space<vmem>>, %arg7: memref<1x128xf32, #tpu.memory_space<vmem>>, %arg8: memref<1x128xf32, #tpu.memory_space<vmem>>, %arg9: memref<2x8xf32, #tpu.memory_space<vmem>>) attributes {dimension_semantics = [#tpu.dimension_semantics<parallel>, #tpu.dimension_semantics<arbitrary>], iteration_bounds = array<i64: 1, 1>, scalar_prefetch = 0 : i64, scratch_operands = 0 : i64, tpu.core_type = #tpu.core_type<tc>, window_params = [{transform_indices = @transform_0, window_bounds = array<i64: 2, 128>}, {transform_indices = @transform_1, window_bounds = array<i64: 8, 2, 128>}, {transform_indices = @transform_2, window_bounds = array<i64: 2, 8>}, {pipeline_mode = #tpu.pipeline_mode<synchronous>, transform_indices = @transform_3, window_bounds = array<i64: 128, 128>}, {pipeline_mode = #tpu.pipeline_mode<synchronous>, transform_indices = @transform_4, window_bounds = array<i64: 128, 128>}, {pipeline_mode = #tpu.pipeline_mode<synchronous>, transform_indices = @transform_5, window_bounds = array<i64: 1, 128>}, {pipeline_mode = #tpu.pipeline_mode<synchronous>, transform_indices = @transform_6, window_bounds = array<i64: 1, 128>}, {transform_indices = @transform_7, window_bounds = array<i64: 2, 8>}]} {
    %c0 = arith.constant 0 : index
    %c0_0 = arith.constant 0 : index
    %0 = vector.load %arg2[%c0, %c0_0] : memref<2x128xf32, #tpu.memory_space<vmem>>, vector<2x128xf32>
    %c0_1 = arith.constant 0 : index
    %c0_2 = arith.constant 0 : index
    %1 = vector.load %arg5[%c0_1, %c0_2] : memref<128x128xf32, #tpu.memory_space<vmem>>, vector<128x128xf32>
    %cst = arith.constant dense<0.000000e+00> : vector<2x128xf32>
    %2 = tpu.matmul %0, %1, %cst {dimension_numbers = #tpu.dot_dimension_numbers<[1], [0], [0], [1], [0, 0, 1, 1], [], []>} : vector<2x128xf32>, vector<128x128xf32>, vector<2x128xf32> -> vector<2x128xf32>
    %c0_3 = arith.constant 0 : index
    %c0_4 = arith.constant 0 : index
    %3 = vector.load %arg7[%c0_3, %c0_4] : memref<1x128xf32, #tpu.memory_space<vmem>>, vector<1x128xf32>
    %4 = vector.broadcast %3 : vector<1x128xf32> to vector<2x128xf32>
    %5 = arith.addf %2, %4 : vector<2x128xf32>
    %c0_5 = arith.constant 0 : index
    %c0_6 = arith.constant 0 : index
    %c0_7 = arith.constant 0 : index
    %6 = vector.load %arg3[%c0_5, %c0_6, %c0_7] : memref<8x2x128xf32, #tpu.memory_space<vmem>>, vector<8x2x128xf32>
    %7 = vector.shape_cast %6 : vector<8x2x128xf32> to vector<16x128xf32>
    %c0_8 = arith.constant 0 : index
    %c0_9 = arith.constant 0 : index
    %8 = vector.load %arg6[%c0_8, %c0_9] : memref<128x128xf32, #tpu.memory_space<vmem>>, vector<128x128xf32>
    %cst_10 = arith.constant dense<0.000000e+00> : vector<16x128xf32>
    %9 = tpu.matmul %7, %8, %cst_10 {dimension_numbers = #tpu.dot_dimension_numbers<[1], [0], [0], [1], [0, 0, 1, 1], [], []>} : vector<16x128xf32>, vector<128x128xf32>, vector<16x128xf32> -> vector<16x128xf32>
    %10 = vector.shape_cast %9 : vector<16x128xf32> to vector<8x2x128xf32>
    %11 = vector.shape_cast %5 : vector<2x128xf32> to vector<1x2x128xf32>
    %12 = vector.broadcast %11 : vector<1x2x128xf32> to vector<8x2x128xf32>
    %13 = arith.addf %10, %12 : vector<8x2x128xf32>
    %14 = math.tanh %13 : vector<8x2x128xf32>
    %c0_11 = arith.constant 0 : index
    %c0_12 = arith.constant 0 : index
    %15 = vector.load %arg8[%c0_11, %c0_12] : memref<1x128xf32, #tpu.memory_space<vmem>>, vector<1x128xf32>
    %16 = vector.shape_cast %15 : vector<1x128xf32> to vector<1x1x128xf32>
    %17 = vector.broadcast %16 : vector<1x1x128xf32> to vector<8x2x128xf32>
    %18 = arith.mulf %14, %17 : vector<8x2x128xf32>
    %cst_13 = arith.constant dense<0.000000e+00> : vector<8x2xf32>
    %19 = vector.multi_reduction <add>, %18, %cst_13 [2] : vector<8x2x128xf32> to vector<8x2xf32>
    %20 = tpu.transpose %19, [1, 0] : vector<8x2xf32> -> vector<2x8xf32>
    %21 = tpu.iota {dimensions = array<i32: 1>} : vector<2x8xi32>
    %c8_i32 = arith.constant 8 : i32
    %22 = arith.muli %arg1, %c8_i32 : i32
    %23 = vector.broadcast %22 : i32 to vector<2x8xi32>
    %24 = arith.addi %21, %23 : vector<2x8xi32>
    %c0_14 = arith.constant 0 : index
    %c0_15 = arith.constant 0 : index
    %25 = vector.load %arg4[%c0_14, %c0_15] : memref<2x8xi32, #tpu.memory_space<vmem>>, vector<2x8xi32>
    %c0_i32 = arith.constant 0 : i32
    %26 = vector.broadcast %c0_i32 : i32 to vector<2x8xi32>
    %27 = arith.cmpi ne, %25, %26 : vector<2x8xi32>
    %cst_16 = arith.constant -1.000000e+10 : f32
    %28 = vector.broadcast %cst_16 : f32 to vector<2x8xf32>
    %29 = arith.select %27, %20, %28 : vector<2x8xi1>, vector<2x8xf32>
    %c8_i32_17 = arith.constant 8 : i32
    %30 = vector.broadcast %c8_i32_17 : i32 to vector<2x8xi32>
    %31 = arith.cmpi slt, %24, %30 : vector<2x8xi32>
    %cst_18 = arith.constant 0xFF800000 : f32
    %32 = vector.broadcast %cst_18 : f32 to vector<2x8xf32>
    %33 = arith.select %31, %29, %32 : vector<2x8xi1>, vector<2x8xf32>
    %cst_19 = arith.constant dense<0xFF800000> : vector<2xf32>
    %34 = vector.multi_reduction <maximumf>, %33, %cst_19 [1] : vector<2x8xf32> to vector<2xf32>
    %35 = vector.shape_cast %34 : vector<2xf32> to vector<2x1xf32>
    %36 = vector.broadcast %35 : vector<2x1xf32> to vector<2x8xf32>
    %37 = arith.subf %33, %36 : vector<2x8xf32>
    %38 = math.exp %37 : vector<2x8xf32>
    %cst_20 = arith.constant dense<0.000000e+00> : vector<2xf32>
    %39 = vector.multi_reduction <add>, %38, %cst_20 [1] : vector<2x8xf32> to vector<2xf32>
    %40 = vector.shape_cast %39 : vector<2xf32> to vector<2x1xf32>
    %cst_21 = arith.constant 1.000000e+00 : f32
    %41 = vector.broadcast %cst_21 : f32 to vector<2x1xf32>
    %42 = arith.divf %41, %40 : vector<2x1xf32>
    %43 = vector.broadcast %42 : vector<2x1xf32> to vector<2x8xf32>
    %44 = arith.mulf %38, %43 : vector<2x8xf32>
    %c0_22 = arith.constant 0 : index
    %c0_23 = arith.constant 0 : index
    %45 = vector.load %arg9[%c0_22, %c0_23] : memref<2x8xf32, #tpu.memory_space<vmem>>, vector<2x8xf32>
    tpu.vector_store %arg9[%c0_22, %c0_23], %44 {strides = array<i32>} : memref<2x8xf32, #tpu.memory_space<vmem>>, vector<2x8xf32>,
    return
  }
  func.func @transform_0(%arg0: i32, %arg1: i32) -> (i32, i32) {
    %c0_i32 = arith.constant 0 : i32
    %c0_i32_0 = arith.constant 0 : i32
    return %arg0, %c0_i32 : i32, i32
  }
  func.func @transform_1(%arg0: i32, %arg1: i32) -> (i32, i32, i32) {
    %c0_i32 = arith.constant 0 : i32
    %c0_i32_0 = arith.constant 0 : i32
    return %arg1, %arg0, %c0_i32 : i32, i32, i32
  }
  func.func @transform_2(%arg0: i32, %arg1: i32) -> (i32, i32) {
    %c0_i32 = arith.constant 0 : i32
    return %arg0, %arg1 : i32, i32
  }
  func.func @transform_3(%arg0: i32, %arg1: i32) -> (i32, i32) {
    %c0_i32 = arith.constant 0 : i32
    %c0_i32_0 = arith.constant 0 : i32
    %c0_i32_1 = arith.constant 0 : i32
    return %c0_i32, %c0_i32_0 : i32, i32
  }
  func.func @transform_4(%arg0: i32, %arg1: i32) -> (i32, i32) {
    %c0_i32 = arith.constant 0 : i32
    %c0_i32_0 = arith.constant 0 : i32
    %c0_i32_1 = arith.constant 0 : i32
    return %c0_i32, %c0_i32_0 : i32, i32
  }
  func.func @transform_5(%arg0: i32, %arg1: i32) -> (i32, i32) {
    %c0_i32 = arith.constant 0 : i32
    %c0_i32_0 = arith.constant 0 : i32
    %c0_i32_1 = arith.constant 0 : i32
    return %c0_i32, %c0_i32_0 : i32, i32
  }
  func.func @transform_6(%arg0: i32, %arg1: i32) -> (i32, i32) {
    %c0_i32 = arith.constant 0 : i32
    %c0_i32_0 = arith.constant 0 : i32
    %c0_i32_1 = arith.constant 0 : i32
    return %c0_i32, %c0_i32_0 : i32, i32
  }
  func.func @transform_7(%arg0: i32, %arg1: i32) -> (i32, i32) {
    %c0_i32 = arith.constant 0 : i32
    %c0_i32_0 = arith.constant 0 : i32
    return %arg0, %c0_i32 : i32, i32
  }
}

</mosaic_0001>

<bundles_post_ra>
// kernel: tpu_custom_call.1
= control target key start
LH: loop header
LB: loop body
LE: loop exit
PB: predicated region body
PF: predicated region fallthrough
CT: control target
= control target key end

     0   :  { %12 = vsyncpa [#allocation3], 0  ;;  %s902_s0 = inlined_call_operand.hbm [shape: f32[2,128], index: 0, kind: input, shape index: {}]   ;;  %s903_s1 = inlined_call_operand.hbm [shape: f32[8,2,128], index: 1, kind: input, shape index: {}]   ;;  %s904_s2 = inlined_call_operand.vmem [shape: s32[2,8], index: 2, kind: input, shape index: {}]   ;;  %s905_s3 = inlined_call_operand.hbm [shape: f32[128,128], index: 3, kind: input, shape index: {}]   ;;  %s906_s4 = inlined_call_operand.hbm [shape: f32[128,128], index: 4, kind: input, shape index: {}]   ;;  %s907_s5 = inlined_call_operand.vmem [shape: f32[1,128], index: 5, kind: input, shape index: {}]   ;;  %s908_s6 = inlined_call_operand.vmem [shape: f32[1,128], index: 6, kind: input, shape index: {}]   ;;  %s909_s7 = inlined_call_operand.hbm [shape: f32[2,8], index: 7, kind: output, shape index: {}]  }
   0x1   :  { %13 = vsyncpa [#allocation6], 0 }
   0x2   :  { %14 = vsyncpa [#allocation9], 0 }
   0x3   :  { %15 = vsyncpa [#allocation4], 0  ;;  %s792_s24 = smov [#allocation5]  }
   0x4   :  { %s31_s25 = sshll.u32 %s792_s24, 4  ;;  %s32_s25 = int_to_ptr.vmem [resolvable:$true] %s31_s25 }
   0x5   :  { %s692_s26 = scalar_lea.vmem %s32_s25, 256  ;;  %p697_p1 = scmp.lt.s32.totalorder %s32_s25, %s32_s25 }
   0x6   :  { %p693_p0 = scmp.ne.s32.totalorder %s32_s25, %s692_s26  ;;  %p698_p2 = scmp.lt.s32.totalorder %s692_s26, %s692_s26 }
   0x8   :  { %p699_p3 = por %p698_p2, %p697_p1 }
   0xa   :  { %p700_p4 = pnand %p699_p3, %p693_p0 }
   0xc   :  { %703 = shalt.err (!%p700_p4)
}
   0xd   :  { %s793_s27 = smov 32   ;;  %s794_s28 = smov 2  }
   0xe   :  { %37 = dma.hbm_to_vmem [thread:$0]  %s903_s1, 256, %s32_s25, [#allocation6], %s793_s27, %s793_s27, %s794_s28  }
   0xf   :  { %s795_s8 = smov [#allocation2]   ;;  %s796_s10 = smov [#allocation7]  }
  0x10   :  { %s22_s9 = sshll.u32 %s795_s8, 4  ;;  %s45_s11 = sshll.u32 %s796_s10, 4  ;;  %s23_s9 = int_to_ptr.vmem [resolvable:$true] %s22_s9  ;;  %s46_s11 = int_to_ptr.vmem [resolvable:$true] %s45_s11 }
  0x11   :  { %s712_s12 = scalar_lea.vmem %s23_s9, 32  ;;  %p717_p6 = scmp.lt.s32.totalorder %s23_s9, %s23_s9 }
  0x12   :  { %p713_p5 = scmp.ne.s32.totalorder %s23_s9, %s712_s12  ;;  %p718_p7 = scmp.lt.s32.totalorder %s712_s12, %s712_s12 }
  0x14   :  { %p719_p8 = por %p718_p7, %p717_p6 }
  0x16   :  { %p720_p9 = pnand %p719_p8, %p713_p5 }
  0x18   :  { %723 = shalt.err (!%p720_p9)
}
  0x19   :  { %25 = dma.hbm_to_vmem [thread:$0]  %s902_s0, 32, %s23_s9, [#allocation3]  }
  0x1a   :  { %s732_s15 = scalar_lea.vmem %s46_s11, 2048  ;;  %p737_p11 = scmp.lt.s32.totalorder %s46_s11, %s46_s11 }
  0x1b   :  { %p733_p10 = scmp.ne.s32.totalorder %s46_s11, %s732_s15  ;;  %p738_p12 = scmp.lt.s32.totalorder %s732_s15, %s732_s15 }
  0x1d   :  { %p739_p13 = por %p738_p12, %p737_p11 }
  0x1f   :  { %p740_p0 = pnand %p739_p13, %p733_p10 }
  0x21   :  { %743 = shalt.err (!%p740_p0)
}
  0x22   :  { %s797_s1 = smov 128   ;;  %s798_s16 = smov 8  }
  0x23   :  { %51 = dma.hbm_to_vmem [thread:$0]  %s905_s3, 2048, %s46_s11, [#allocation6], %s797_s1, %s797_s1, %s798_s16  }
  0x24   :  { %s799_s19 = smov [#allocation8]  }
  0x25   :  { %s57_s20 = sshll.u32 %s799_s19, 4  ;;  %s58_s20 = int_to_ptr.vmem [resolvable:$true] %s57_s20 }
  0x26   :  { %s752_s21 = scalar_lea.vmem %s58_s20, 2048  ;;  %p757_p2 = scmp.lt.s32.totalorder %s58_s20, %s58_s20 }
  0x27   :  { %p753_p1 = scmp.ne.s32.totalorder %s58_s20, %s752_s21  ;;  %p758_p3 = scmp.lt.s32.totalorder %s752_s21, %s752_s21 }
  0x29   :  { %p759_p4 = por %p758_p3, %p757_p2 }
  0x2b   :  { %p760_p5 = pnand %p759_p4, %p753_p1 }
  0x2d   :  { %763 = shalt.err (!%p760_p5)
}
  0x2e   :  { %63 = dma.hbm_to_vmem [thread:$0]  %s906_s4, 2048, %s58_s20, [#allocation9], %s797_s1, %s797_s1, %s798_s16  }
  0x2f   :  { %784 = dma.done.wait [#allocation3], 32  }
  0x30   :  { %785 = vsyncadd [#allocation3], 4294967264 }
  0x31   :  { %786 = dma.done.wait [#allocation6], 2304  }
  0x32   :  { %787 = vsyncadd [#allocation6], 4294964992 }
  0x33   :  { %788 = dma.done.wait [#allocation9], 2048  }
  0x34   :  { %789 = vsyncadd [#allocation9], 4294965248  ;;  %v800_v0 = vmov 0.0   ;;  %vm801_vm0 = vmmov 0   ;;  %v197_v1 = vld [vmem:[#allocation8 + $0x78] sm:$0xff]  ;;  %v196_v3 = vld [vmem:[#allocation8 + $0x70] sm:$0xff]  ;;  %v211_v19 = vlaneseq }
  0x35   :  { %582 = vmatprep.subr.mxu0 %v800_v0  ;;  %614 = vmatprep.mubr.msk.f32.mxu0 %vm801_vm0, %v800_v0  ;;  %v96_v2 = vld [vmem:[#allocation7 + $0x78] sm:$0xff]  ;;  %v95_v4 = vld [vmem:[#allocation7 + $0x70] sm:$0xff]  ;;  %v195_v5 = vld [vmem:[#allocation8 + $0x68] sm:$0xff]  ;;  %v802_v17 = vmov 1983009808   ;;  %vm392_vm1 = vcmask 1041408  }
  0x36   :  { %617 = vmatprep.subr.mxu1 %v197_v1  ;;  %583 = vmatpush3.msra.mxu0 %v96_v2  ;;  %v94_v6 = vld [vmem:[#allocation7 + $0x68] sm:$0xff]  ;;  %v194_v7 = vld [vmem:[#allocation8 + $0x60] sm:$0xff]  ;;  %v193_v9 = vld [vmem:[#allocation8 + $0x58] sm:$0xff]  ;;  %v209_v18 = vunpack.c.l.s4 %v802_v17  ;;  %v867_v29 = vshrl.u32 %v211_v19, 7  ;;  %vm459_vm2 = vcmask 1041409   ;;  %vm461_vm3 = vcmask 1042434  }
  0x37   :  { %618 = vmatpush3.msra.mxu1 %v197_v1  ;;  %584 = vmatprep.subr.mxu0 %v800_v0  ;;  %v93_v8 = vld [vmem:[#allocation7 + $0x60] sm:$0xff]  ;;  %v92_v10 = vld [vmem:[#allocation7 + $0x58] sm:$0xff]  ;;  %v192_v11 = vld [vmem:[#allocation8 + $0x50] sm:$0xff]  ;;  %vm463_vm4 = vcmask 1043459   ;;  %vm465_vm5 = vcmask 1044484   ;;  %vm467_vm6 = vcmask 1045509  }
  0x38   :  { %619 = vmatprep.subr.mxu1 %v196_v3  ;;  %585 = vmatpush3.msra.mxu0 %v95_v4  ;;  %v91_v12 = vld [vmem:[#allocation7 + $0x50] sm:$0xff]  ;;  %v191_v13 = vld [vmem:[#allocation8 + $0x48] sm:$0xff]  ;;  %v190_v15 = vld [vmem:[#allocation8 + $0x40] sm:$0xff]  ;;  %v210_v28 = vunpack.c.0.s8 %v209_v18  ;;  %vm469_vm7 = vcmask 1046534   ;;  %vm471_vm8 = vcmask 1047559   ;;  %vm514_vm11 = vcmask 58368  }
  0x39   :  { %620 = vmatpush3.msra.mxu1 %v196_v3  ;;  %586 = vmatprep.subr.mxu0 %v800_v0  ;;  %v90_v14 = vld [vmem:[#allocation7 + $0x48] sm:$0xff]  ;;  %v89_v16 = vld [vmem:[#allocation7 + $0x40] sm:$0xff]  ;;  %v189_v20 = vld [vmem:[#allocation8 + $0x38] sm:$0xff] }
  0x3a   :  { %621 = vmatprep.subr.mxu1 %v195_v5  ;;  %587 = vmatpush3.msra.mxu0 %v94_v6  ;;  %v88_v21 = vld [vmem:[#allocation7 + $0x38] sm:$0xff]  ;;  %v188_v22 = vld [vmem:[#allocation8 + $0x30] sm:$0xff]  ;;  %v187_v24 = vld [vmem:[#allocation8 + $0x28] sm:$0xff]  ;;  %v213_v40 = vsub.s32 %v210_v28, %v867_v29 }
  0x3b   :  { %622 = vmatpush3.msra.mxu1 %v195_v5  ;;  %588 = vmatprep.subr.mxu0 %v800_v0  ;;  %v87_v23 = vld [vmem:[#allocation7 + $0x30] sm:$0xff]  ;;  %v86_v25 = vld [vmem:[#allocation7 + $0x28] sm:$0xff]  ;;  %v178_v32 = vld [vmem:[#allocation5 + $0x8] sm:$0x3] }
  0x3c   :  { %623 = vmatprep.subr.mxu1 %v194_v7  ;;  %589 = vmatpush3.msra.mxu0 %v93_v8  ;;  %v174_v26 = vld [vmem:[#allocation5] sm:$0x3]  ;;  %v175_v27 = vld [vmem:[#allocation5 + $0x2] sm:$0x3]  ;;  %v176_v30 = vld [vmem:[#allocation5 + $0x4] sm:$0x3] }
  0x3d   :  { %624 = vmatpush3.msra.mxu1 %v194_v7  ;;  %590 = vmatprep.subr.mxu0 %v800_v0  ;;  %v177_v31 = vld [vmem:[#allocation5 + $0x6] sm:$0x3]  ;;  %v179_v33 = vld [vmem:[#allocation5 + $0xa] sm:$0x3]  ;;  %v180_v34 = vld [vmem:[#allocation5 + $0xc] sm:$0x3]  ;;  %v206_v38 = vcombine.low %v174_v26, %v175_v27 }
  0x3e   :  { %625 = vmatprep.subr.mxu1 %v193_v9  ;;  %591 = vmatpush3.msra.mxu0 %v92_v10  ;;  %v181_v35 = vld [vmem:[#allocation5 + $0xe] sm:$0x3]  ;;  %v186_v36 = vld [vmem:[#allocation8 + $0x20] sm:$0xff]  ;;  %v207_v39 = vcombine.low %v176_v30, %v177_v31  ;;  %v223_v41 = vcombine.low %v178_v32, %v179_v33  ;;  %v184_v45 = vld [vmem:[#allocation8 + $0x10] sm:$0xff] }
  0x3f   :  { %626 = vmatpush3.msra.mxu1 %v193_v9  ;;  %592 = vmatprep.subr.mxu0 %v800_v0  ;;  %v85_v37 = vld [vmem:[#allocation7 + $0x20] sm:$0xff]  ;;  %v224_v42 = vcombine.low %v180_v34, %v181_v35  ;;  %v185_v43 = vld [vmem:[#allocation8 + $0x18] sm:$0xff]  ;;  %v83_v46 = vld [vmem:[#allocation7 + $0x10] sm:$0xff]  ;;  %v214_v47 = vrot.slane %v206_v38, %v213_v40 }
  0x40   :  { %627 = vmatprep.subr.mxu1 %v192_v11  ;;  %593 = vmatpush3.msra.mxu0 %v91_v12  ;;  %v84_v44 = vld [vmem:[#allocation7 + $0x18] sm:$0xff]  ;;  %v221_v48 = vrot.slane %v207_v39, %v213_v40  ;;  %v231_v49 = vrot.slane %v223_v41, %v213_v40  ;;  %v183_v51 = vld [vmem:[#allocation8 + $0x8] sm:$0xff]  ;;  %v182_v53 = vld [vmem:[#allocation8] sm:$0xff] }
  0x41   :  { %628 = vmatpush3.msra.mxu1 %v192_v11  ;;  %594 = vmatprep.subr.mxu0 %v800_v0  ;;  %v238_v50 = vrot.slane %v224_v42, %v213_v40  ;;  %v82_v52 = vld [vmem:[#allocation7 + $0x8] sm:$0xff]  ;;  %v81_v54 = vld [vmem:[#allocation7] sm:$0xff] }
  0x42   :  { %629 = vmatprep.subr.mxu1 %v191_v13  ;;  %595 = vmatpush3.msra.mxu0 %v90_v14  ;;  %v222_v55 = vcombine.low %v214_v47, %v221_v48  ;;  %v80_v57 = vld [vmem:[#allocation2] sm:$0x3] }
  0x43   :  { %630 = vmatpush3.msra.mxu1 %v191_v13  ;;  %596 = vmatprep.subr.mxu0 %v800_v0  ;;  %v239_v56 = vcombine.low %v231_v49, %v238_v50  ;;  %v545_v58 = vld [vmem:[%s907_s5] ss:$0 sm:$0xff] }
  0x44   :  { %631 = vmatprep.subr.mxu1 %v190_v15  ;;  %597 = vmatpush3.msra.mxu0 %v89_v16 }
  0x45   :  { %632 = vmatpush3.msra.mxu1 %v190_v15  ;;  %598 = vmatprep.subr.mxu0 %v800_v0 }
  0x46   :  { %633 = vmatprep.subr.mxu1 %v189_v20  ;;  %599 = vmatpush3.msra.mxu0 %v88_v21 }
  0x47   :  { %634 = vmatpush3.msra.mxu1 %v189_v20  ;;  %600 = vmatprep.subr.mxu0 %v800_v0  ;;  %v546_v20 = vld [vmem:[%s908_s6] ss:$0 sm:$0xff] }
  0x48   :  { %635 = vmatprep.subr.mxu1 %v188_v22  ;;  %601 = vmatpush3.msra.mxu0 %v87_v23 }
  0x49   :  { %636 = vmatpush3.msra.mxu1 %v188_v22  ;;  %602 = vmatprep.subr.mxu0 %v800_v0 }
  0x4a   :  { %637 = vmatprep.subr.mxu1 %v187_v24  ;;  %603 = vmatpush3.msra.mxu0 %v86_v25 }
  0x4b   :  { %638 = vmatpush3.msra.mxu1 %v187_v24  ;;  %604 = vmatprep.subr.mxu0 %v800_v0 }
  0x4c   :  { %639 = vmatprep.subr.mxu1 %v186_v36  ;;  %605 = vmatpush3.msra.mxu0 %v85_v37 }
  0x4d   :  { %640 = vmatpush3.msra.mxu1 %v186_v36  ;;  %606 = vmatprep.subr.mxu0 %v800_v0 }
  0x4e   :  { %641 = vmatprep.subr.mxu1 %v185_v43  ;;  %607 = vmatpush3.msra.mxu0 %v84_v44 }
  0x4f   :  { %642 = vmatpush3.msra.mxu1 %v185_v43  ;;  %608 = vmatprep.subr.mxu0 %v800_v0 }
  0x50   :  { %643 = vmatprep.subr.mxu1 %v184_v45  ;;  %609 = vmatpush3.msra.mxu0 %v83_v46 }
  0x51   :  { %644 = vmatpush3.msra.mxu1 %v184_v45  ;;  %610 = vmatprep.subr.mxu0 %v800_v0  ;;  %v426_v45 = vand.u32 127, %v211_v19 }
  0x52   :  { %645 = vmatprep.subr.mxu1 %v183_v51  ;;  %611 = vmatpush3.msra.mxu0 %v82_v52 }
  0x53   :  { %646 = vmatpush3.msra.mxu1 %v183_v51  ;;  %612 = vmatprep.subr.mxu0 %v800_v0  ;;  %v429_v48 = vsub.s32 %v426_v45, %v867_v29  ;;  %vm512_vm10 = vcmp.lt.s32.totalorder %v426_v45, 8 }
  0x54   :  { %647 = vmatprep.subr.mxu1 %v182_v53  ;;  %613 = vmatpush3.msra.mxu0 %v81_v54 }
  0x55   :  { %648 = vmatpush3.msra.mxu1 %v182_v53  ;;  %649 = vmatprep.mubr.f32.mxu1 %v222_v55 }
  0x56   :  { %615 = vmatmul.mubr.f32.vlgmr.msra.gmra.mxu0 %v80_v57  ;;  %650 = vmatmul.mubr.f32.vlgmr.msra.gmra.mxu1 %v239_v56 }
 0x116   :  { %v170_v59 = vpop.f32.mrf.mxu0  ;;  %v651_v60 = vpop.f32.mrf.mxu1 }
 0x117   :  { %v336_v61 = vcombine.high %v651_v60, %v651_v60  ;;  %v343_v62 = vrot.slane %v651_v60, %v213_v40  ;;  %v171_v2 = vadd.f32 %v545_v58, %v170_v59 }
 0x118   :  { %v616_v63 = vpop.f32.mrf.mxu0  ;;  %v308_v1 = vpop.f32.mrf.mxu1 }
 0x119   :  { %v351_v3 = vcombine.high %v343_v62, %v343_v62  ;;  %v319_v0 = vcombine.high %v308_v1, %v308_v1  ;;  %v350_v4 = vrot.slane %v336_v61, %v213_v40  ;;  %v326_v5 = vrot.slane %v308_v1, %v213_v40 }
 0x11a   :  { %v365_v14 = vadd.f32 %v343_v62, %v171_v2 }
 0x11b   :  { %v366_v6 = vadd.f32 %v351_v3, %v171_v2  ;;  %v333_v7 = vrot.slane %v319_v0, %v213_v40  ;;  %v334_v8 = vcombine.high %v326_v5, %v326_v5  ;;  %v361_v9 = vadd.f32 %v326_v5, %v171_v2 }
 0x11c   :  { %v352_v10 = vcombine.high %v350_v4, %v350_v4  ;;  %v367_v17 = vadd.f32 %v350_v4, %v171_v2  ;;  %v509_v4 = vld [vmem:[%s904_s2] sm:$0x3]  ;;  %s803_s2 = smov [#allocation10]  }
 0x11d   :  { %664 = vtanh.f32 %v366_v6  ;;  %v335_v11 = vcombine.high %v333_v7, %v333_v7  ;;  %v362_v12 = vadd.f32 %v334_v8, %v171_v2  ;;  %v363_v13 = vadd.f32 %v333_v7, %v171_v2  ;;  %s534_s25 = sshll.u32 %s803_s2, 4  ;;  %s535_s25 = int_to_ptr.vmem [resolvable:$true] %s534_s25 }
 0x11e   :  { %666 = vtanh.f32 %v361_v9  ;;  %v368_v16 = vadd.f32 %v352_v10, %v171_v2  ;;  %vm510_vm9 = vcmp.ne.s32.totalorder %v509_v4, 0  ;;  %s764_s26 = scalar_lea.vmem %s535_s25, 32  ;;  %p769_p7 = scmp.lt.s32.totalorder %s535_s25, %s535_s25 }
 0x11f   :  { %v364_v15 = vadd.f32 %v335_v11, %v171_v2  ;;  %668 = vtanh.f32 %v362_v12  ;;  %p765_p6 = scmp.ne.s32.totalorder %s535_s25, %s764_s26  ;;  %p770_p8 = scmp.lt.s32.totalorder %s764_s26, %s764_s26 }
 0x120   :  { %670 = vtanh.f32 %v363_v13 }
 0x121   :  { %672 = vtanh.f32 %v364_v15  ;;  %p771_p9 = por %p770_p8, %p769_p7 }
 0x122   :  { %674 = vtanh.f32 %v365_v14 }
 0x123   :  { %676 = vtanh.f32 %v368_v16  ;;  %p772_p10 = pnand %p771_p9, %p765_p6 }
 0x124   :  { %678 = vtanh.f32 %v367_v17 }
 0x12a   :  { %v665_v18 = vpop.eup %664 }
 0x12b   :  { %v389_v21 = vmul.f32 %v665_v18, %v546_v20  ;;  %v667_v22 = vpop.eup %666 }
 0x12c   :  { %v669_v24 = vpop.eup %668  ;;  %v384_v25 = vmul.f32 %v667_v22, %v546_v20 }
 0x12d   :  { %v408_v23 = vsel %vm392_vm1, %v389_v21, 0.0  ;;  %v671_v26 = vpop.eup %670  ;;  %v385_v31 = vmul.f32 %v669_v24, %v546_v20 }
 0x12e   :  { %409 = vadd.xlane.f32.xlu1 %v408_v23  ;;  %v673_v27 = vpop.eup %672  ;;  %v393_v28 = vsel %vm392_vm1, %v384_v25, 0.0  ;;  %v386_v30 = vmul.f32 %v671_v26, %v546_v20 }
 0x12f   :  { %v675_v32 = vpop.eup %674  ;;  %394 = vadd.xlane.f32.xlu0 %v393_v28  ;;  %v387_v34 = vmul.f32 %v673_v27, %v546_v20  ;;  %v396_v36 = vsel %vm392_vm1, %v385_v31, 0.0 }
 0x130   :  { %v399_v33 = vsel %vm392_vm1, %v386_v30, 0.0  ;;  %v677_v35 = vpop.eup %676  ;;  %v388_v37 = vmul.f32 %v675_v32, %v546_v20 }
 0x131   :  { %v679_v38 = vpop.eup %678  ;;  %v402_v39 = vsel %vm392_vm1, %v387_v34, 0.0  ;;  %v391_v40 = vmul.f32 %v677_v35, %v546_v20 }
 0x132   :  { %400 = vadd.xlane.f32.xlu1 %v399_v33  ;;  %v405_v41 = vsel %vm392_vm1, %v388_v37, 0.0  ;;  %v390_v42 = vmul.f32 %v679_v38, %v546_v20 }
 0x133   :  { %397 = vadd.xlane.f32.xlu0 %v396_v36  ;;  %v414_v43 = vsel %vm392_vm1, %v391_v40, 0.0 }
 0x134   :  { %v411_v44 = vsel %vm392_vm1, %v390_v42, 0.0 }
 0x136   :  { %403 = vadd.xlane.f32.xlu1 %v402_v39 }
 0x137   :  { %406 = vadd.xlane.f32.xlu0 %v405_v41 }
 0x13a   :  { %415 = vadd.xlane.f32.xlu1 %v414_v43 }
 0x13b   :  { %412 = vadd.xlane.f32.xlu0 %v411_v44 }
 0x1b7   :  { %v410_v46 = vpop.xlane.xlu1 %409 }
 0x1b8   :  { %v395_v47 = vpop.xlane.xlu0 %394  ;;  %v450_v60 = vrot.slane %v410_v46, %v429_v48 }
 0x1b9   :  { %v430_v52 = vrot.slane %v395_v47, %v429_v48 }
 0x1bb   :  { %v401_v49 = vpop.xlane.xlu1 %400 }
 0x1bc   :  { %v438_v50 = vrot.slane %v401_v49, %v429_v48  ;;  %v398_v51 = vpop.xlane.xlu0 %397 }
 0x1bd   :  { %v434_v53 = vrot.slane %v398_v51, %v429_v48 }
 0x1bf   :  { %v404_v54 = vpop.xlane.xlu1 %403  ;;  %v460_v55 = vsel %vm459_vm2, %v434_v53, %v430_v52 }
 0x1c0   :  { %v442_v56 = vrot.slane %v404_v54, %v429_v48  ;;  %v462_v57 = vsel %vm461_vm3, %v438_v50, %v460_v55  ;;  %v407_v58 = vpop.xlane.xlu0 %406 }
 0x1c1   :  { %v446_v19 = vrot.slane %v407_v58, %v429_v48 }
 0x1c2   :  { %v464_v59 = vsel %vm463_vm4, %v442_v56, %v462_v57 }
 0x1c3   :  { %v416_v61 = vpop.xlane.xlu1 %415  ;;  %v466_v29 = vsel %vm465_vm5, %v446_v19, %v464_v59 }
 0x1c4   :  { %v458_v62 = vrot.slane %v416_v61, %v429_v48  ;;  %v413_v63 = vpop.xlane.xlu0 %412  ;;  %v468_v1 = vsel %vm467_vm6, %v450_v60, %v466_v29 }
 0x1c5   :  { %v454_v2 = vrot.slane %v413_v63, %v429_v48 }
 0x1c7   :  { %v470_v3 = vsel %vm469_vm7, %v454_v2, %v468_v1 }
 0x1c8   :  { %v472_v0 = vsel %vm471_vm8, %v458_v62, %v470_v3 }
 0x1c9   :  { %474 = vxpose.xlu0.b32.start.end [1/1] (short) (narrow) %v472_v0, 8 }
 0x245   :  { %v490_v5 = vpop.trf.xlu0 }
 0x246   :  { %v511_v6 = vsel %vm510_vm9, %v490_v5, -1e+10 }
 0x247   :  { %v513_v7 = vsel %vm512_vm10, %v511_v6, -inf }
 0x248   :  { %v515_v8 = vsel %vm514_vm11, %v513_v7, -inf }
 0x249   :  { %516 = vmax.xlane.f32.xlu1 %v515_v8 }
 0x2d2   :  { %v517_v9 = vpop.xlane.xlu1 %516 }
 0x2d3   :  { %v518_v10 = vsub.f32 %v513_v7, %v517_v9 }
 0x2d5   :  { %v519_v11 = vmul.f32 1.442695, %v518_v10 }
 0x2d7   :  { %680 = vpow2.f32 %v519_v11 }
 0x2e4   :  { %v681_v12 = vpop.eup %680 }
 0x2e5   :  { %v521_v13 = vsel %vm514_vm11, %v681_v12, 0.0 }
 0x2e6   :  { %522 = vadd.xlane.f32.xlu1 %v521_v13 }
 0x36f   :  { %v523_v14 = vpop.xlane.xlu1 %522 }
 0x370   :  { %682 = vrcp.f32 %v523_v14 }
 0x37d   :  { %v683_v15 = vpop.eup %682 }
 0x37e   :  { %v526_v16 = vmul.f32 %v683_v15, %v681_v12 }
 0x380   :  { %527 = vst.msk [vmem:[#allocation10] sm:$0x3] %vm514_vm11, %v526_v16 }
 0x381   :  { %775 = shalt.err (!%p772_p10)
}
 0x382   :  { %537 = dma.vmem_to_hbm [thread:$0]  %s535_s25, 32, %s909_s7, [#allocation4]  }
 0x383   :  { %790 = dma.done.wait [#allocation4], 32  }
 0x384   :  { %791 = vsyncadd [#allocation4], 4294967264 }
 0x385   :  { %541 = vsyncpa [#allocation3], 1 }
 0x386   :  { %542 = vsyncpa [#allocation6], 1 }
 0x387   :  { %543 = vsyncpa [#allocation9], 1 }
 0x388   :  { %544 = vsyncpa [#allocation4], 1 }

</bundles_post_ra>
